<compile_context>
chip_gen: v7x
topology: tpu7x:2x2x1
jax: 0.10.0
libtpu: 0.0.40
codegen_flags: <defaults>
</compile_context>

<pallas_src>
import functools
import math

import jax
import jax.numpy as jnp
from jax.experimental import pallas as pl
from jax.experimental.pallas import tpu as pltpu


def _label_smoothing_kernel(x_ref, tgt_ref, out_ref, *, n_rows, tile_n,
                            padding_idx, confidence, fill, entropy_const):
    i = pl.program_id(0)

    x = x_ref[...].astype(jnp.float32)      # (tile_n, V) upcast after VMEM load
    tgt = tgt_ref[...]                      # (tile_n, 1) int32 class indices
    tn, v = x.shape

    cols = jax.lax.broadcasted_iota(jnp.int32, (tn, v), 1)

    # x gathered at the target column, per row (one select + one XLU reduce).
    x_at_tgt = jnp.sum(jnp.where(cols == tgt, x, 0.0), axis=-1, keepdims=True)
    # x at the (static) padding column and full row sum.
    x_at_pad = x[:, padding_idx:padding_idx + 1]
    row_sum = jnp.sum(x, axis=-1, keepdims=True)

    # sum_j td[r,j] * x[r,j] for non-pad rows (td = fill everywhere except
    # confidence at tgt column and 0 at padding column).
    td_dot_x = confidence * x_at_tgt + fill * (row_sum - x_at_tgt - x_at_pad)

    # KLDivLoss row term: sum(td*log td) - sum(td*x); first term is a constant.
    row_loss = entropy_const - td_dot_x                       # (tile_n, 1)

    # Mask rows whose target is padding_idx and ragged out-of-bounds rows.
    row_ids = i * tile_n + jax.lax.broadcasted_iota(jnp.int32, (tn, 1), 0)
    valid = jnp.logical_and(tgt != padding_idx, row_ids < n_rows)
    row_loss = jnp.where(valid, row_loss, 0.0)

    partial = jnp.sum(row_loss)                                # scalar f32

    # Lane-dense per-tile partial output: value in lane 0, zeros elsewhere.
    lane = jax.lax.broadcasted_iota(jnp.int32, (1, 1, 128), 2)
    out_ref[...] = jnp.where(lane == 0, partial, 0.0)


def label_smoothing_loss(x, target, *, size, padding_idx, smoothing,
                         tile_n=None):
    """x: (N, size) log-probs (any float dtype); target: (N,) int. Scalar f32 loss."""
    n, v = x.shape
    assert v == size

    confidence = 1.0 - smoothing
    if smoothing > 0.0:
        assert size > 2, "smoothing/(size-2) requires size > 2"
        fill = smoothing / (size - 2)
    else:
        fill = 0.0
    # sum(td * log td) for a non-padding row, computed once at trace time.
    c_term = confidence * math.log(confidence) if confidence > 0.0 else 0.0
    f_term = (size - 2) * fill * math.log(fill) if fill > 0.0 else 0.0
    entropy_const = c_term + f_term

    itemsize = jnp.dtype(x.dtype).itemsize
    if tile_n is None:
        # Keep 2 * TILE_N * V * itemsize (the double-buffered x stream) under a
        # ~24 MiB budget so the tile also fits v7x's 64 MiB physical VMEM.
        budget = 24 << 20
        rows_fit = max(8, budget // (2 * v * itemsize))
        cap = int(min(256, rows_fit))
        if n <= cap:
            tile_n = n                      # single full-extent tile is always legal
        else:
            tile_n = max(8, (cap // 8) * 8)  # multiple of 8 for (8,128) tiling
    num_tiles = (n + tile_n - 1) // tile_n

    tgt2d = target.reshape(n, 1).astype(jnp.int32)

    kernel = functools.partial(
        _label_smoothing_kernel,
        n_rows=n, tile_n=tile_n, padding_idx=padding_idx,
        confidence=float(confidence), fill=float(fill),
        entropy_const=float(entropy_const))

    x_bytes = n * v * itemsize
    cost = pl.CostEstimate(
        flops=4 * n * v, transcendentals=0,
        bytes_accessed=x_bytes + n * 4 + num_tiles * 128 * 4)

    vmem_need = 2 * tile_n * v * itemsize + 2 * tile_n * 4 + 2 * 128 * 4
    vmem_limit = int(min(max(2 * vmem_need, 32 << 20), 64 << 20))

    partials = pl.pallas_call(
        kernel,
        out_shape=jax.ShapeDtypeStruct((num_tiles, 1, 128), jnp.float32),
        grid=(num_tiles,),
        in_specs=[
            pl.BlockSpec((tile_n, v), lambda i: (i, 0)),   # x row tile (native dtype)
            pl.BlockSpec((tile_n, 1), lambda i: (i, 0)),   # target row tile
        ],
        out_specs=pl.BlockSpec((1, 1, 128), lambda i: (i, 0, 0)),
        compiler_params=pltpu.CompilerParams(
            dimension_semantics=("parallel",),             # megacore-shardable on v7x
            vmem_limit_bytes=vmem_limit),
        cost_estimate=cost,
    )(x, tgt2d)

    return jnp.sum(partials)


def _reference(x, target, *, size, padding_idx, smoothing):
    # Pure-JAX reference mirroring the PyTorch module.
    n, v = x.shape
    confidence = 1.0 - smoothing
    cols = jnp.arange(v)[None, :]
    tgt = target[:, None]
    td = jnp.where(cols == tgt, confidence, smoothing / (size - 2))
    td = jnp.where(cols == padding_idx, 0.0, td)
    td = jnp.where(tgt == padding_idx, 0.0, td)
    log_td = jnp.where(td > 0, jnp.log(jnp.maximum(td, 1e-30)), 0.0)
    return jnp.sum(td * log_td - td * x.astype(jnp.float32))


if __name__ == "__main__":
    SIZE = 32          # vocabulary size (x.size(1))
    PADDING_IDX = 0
    SMOOTHING = 0.1
    N = 8              # number of tokens / rows

    key = jax.random.PRNGKey(0)
    kx, kt = jax.random.split(key)

    logits = jax.random.normal(kx, (N, SIZE), dtype=jnp.float32)
    x = jax.nn.log_softmax(logits, axis=-1)          # module expects log-probs
    target = jax.random.randint(kt, (N,), 0, SIZE, dtype=jnp.int32)
    # force a couple of padding targets to exercise the row-masking path
    target = target.at[1].set(PADDING_IDX).at[5].set(PADDING_IDX)

    loss = label_smoothing_loss(x, target, size=SIZE,
                                padding_idx=PADDING_IDX, smoothing=SMOOTHING)
    jax.block_until_ready(loss)
    ref = _reference(x, target, size=SIZE,
                     padding_idx=PADDING_IDX, smoothing=SMOOTHING)
    assert jnp.allclose(loss, ref, rtol=1e-5, atol=1e-5), (loss, ref)

    # Second check: multi-tile grid with a ragged final tile (N=20, TILE_N=8).
    N2 = 20
    kx2, kt2 = jax.random.split(jax.random.PRNGKey(1))
    x2 = jax.nn.log_softmax(
        jax.random.normal(kx2, (N2, SIZE), dtype=jnp.float32), axis=-1)
    t2 = jax.random.randint(kt2, (N2,), 0, SIZE, dtype=jnp.int32)
    t2 = t2.at[0].set(PADDING_IDX).at[13].set(PADDING_IDX)
    loss2 = label_smoothing_loss(x2, t2, size=SIZE, padding_idx=PADDING_IDX,
                                 smoothing=SMOOTHING, tile_n=8)
    jax.block_until_ready(loss2)
    ref2 = _reference(x2, t2, size=SIZE, padding_idx=PADDING_IDX,
                      smoothing=SMOOTHING)
    assert jnp.allclose(loss2, ref2, rtol=1e-5, atol=1e-5), (loss2, ref2)

    print("KERNEL_OK")
</pallas_src>

<mosaic_0001>
module attributes {stable_mosaic.version = 11 : i64} {
  func.func @_label_smoothing_kernel(%arg0: i32, %arg1: memref<8x32xf32, #tpu.memory_space<vmem>>, %arg2: memref<8x1xi32, #tpu.memory_space<vmem>>, %arg3: memref<1x1x128xf32, #tpu.memory_space<vmem>>) attributes {dimension_semantics = [#tpu.dimension_semantics<parallel>], iteration_bounds = array<i64: 1>, scalar_prefetch = 0 : i64, scratch_operands = 0 : i64, tpu.core_type = #tpu.core_type<tc>, window_params = [{transform_indices = @transform_0, window_bounds = array<i64: 8, 32>}, {transform_indices = @transform_1, window_bounds = array<i64: 8, 1>}, {transform_indices = @transform_2, window_bounds = array<i64: 1, 1, 128>}]} {
    %c0 = arith.constant 0 : index
    %c0_0 = arith.constant 0 : index
    %0 = vector.load %arg1[%c0, %c0_0] : memref<8x32xf32, #tpu.memory_space<vmem>>, vector<8x32xf32>
    %c0_1 = arith.constant 0 : index
    %c0_2 = arith.constant 0 : index
    %1 = vector.load %arg2[%c0_1, %c0_2] : memref<8x1xi32, #tpu.memory_space<vmem>>, vector<8x1xi32>
    %2 = tpu.iota {dimensions = array<i32: 1>} : vector<8x32xi32>
    %3 = vector.broadcast %1 : vector<8x1xi32> to vector<8x32xi32>
    %4 = arith.cmpi eq, %2, %3 : vector<8x32xi32>
    %cst = arith.constant 0.000000e+00 : f32
    %5 = vector.broadcast %cst : f32 to vector<8x32xf32>
    %6 = arith.select %4, %0, %5 : vector<8x32xi1>, vector<8x32xf32>
    %cst_3 = arith.constant dense<0.000000e+00> : vector<8xf32>
    %7 = vector.multi_reduction <add>, %6, %cst_3 [1] : vector<8x32xf32> to vector<8xf32>
    %8 = vector.shape_cast %7 : vector<8xf32> to vector<8x1xf32>
    %9 = vector.extract_strided_slice %0 {offsets = [0, 0], sizes = [8, 1], strides = [1, 1]} : vector<8x32xf32> to vector<8x1xf32>
    %cst_4 = arith.constant dense<0.000000e+00> : vector<8xf32>
    %10 = vector.multi_reduction <add>, %0, %cst_4 [1] : vector<8x32xf32> to vector<8xf32>
    %11 = vector.shape_cast %10 : vector<8xf32> to vector<8x1xf32>
    %cst_5 = arith.constant 0.899999976 : f32
    %12 = vector.broadcast %cst_5 : f32 to vector<8x1xf32>
    %13 = arith.mulf %12, %8 : vector<8x1xf32>
    %14 = arith.subf %11, %8 : vector<8x1xf32>
    %15 = arith.subf %14, %9 : vector<8x1xf32>
    %cst_6 = arith.constant 0.00333333341 : f32
    %16 = vector.broadcast %cst_6 : f32 to vector<8x1xf32>
    %17 = arith.mulf %16, %15 : vector<8x1xf32>
    %18 = arith.addf %13, %17 : vector<8x1xf32>
    %cst_7 = arith.constant -0.665202737 : f32
    %19 = vector.broadcast %cst_7 : f32 to vector<8x1xf32>
    %20 = arith.subf %19, %18 : vector<8x1xf32>
    %c8_i32 = arith.constant 8 : i32
    %21 = arith.muli %arg0, %c8_i32 : i32
    %22 = tpu.iota {dimensions = array<i32: 0>} : vector<8x1xi32>
    %23 = vector.broadcast %21 : i32 to vector<8x1xi32>
    %24 = arith.addi %23, %22 : vector<8x1xi32>
    %c0_i32 = arith.constant 0 : i32
    %25 = vector.broadcast %c0_i32 : i32 to vector<8x1xi32>
    %26 = arith.cmpi ne, %1, %25 : vector<8x1xi32>
    %c8_i32_8 = arith.constant 8 : i32
    %27 = vector.broadcast %c8_i32_8 : i32 to vector<8x1xi32>
    %28 = arith.cmpi slt, %24, %27 : vector<8x1xi32>
    %29 = arith.andi %26, %28 : vector<8x1xi1>
    %cst_9 = arith.constant 0.000000e+00 : f32
    %30 = vector.broadcast %cst_9 : f32 to vector<8x1xf32>
    %31 = arith.select %29, %20, %30 : vector<8x1xi1>, vector<8x1xf32>
    %32 = vector.shape_cast %31 : vector<8x1xf32> to vector<1x8x1xf32>
    %cst_10 = arith.constant dense<0.000000e+00> : vector<1xf32>
    %33 = vector.multi_reduction <add>, %32, %cst_10 [1, 2] : vector<1x8x1xf32> to vector<1xf32>
    %34 = vector.shape_cast %33 : vector<1xf32> to vector<1x1x1xf32>
    %35 = vector.extract %34[0, 0, 0] : f32 from vector<1x1x1xf32>
    %36 = tpu.iota {dimensions = array<i32: 2>} : vector<1x1x128xi32>
    %c0_i32_11 = arith.constant 0 : i32
    %37 = vector.broadcast %c0_i32_11 : i32 to vector<1x1x128xi32>
    %38 = arith.cmpi eq, %36, %37 : vector<1x1x128xi32>
    %cst_12 = arith.constant 0.000000e+00 : f32
    %39 = vector.broadcast %35 : f32 to vector<1x1x128xf32>
    %40 = vector.broadcast %cst_12 : f32 to vector<1x1x128xf32>
    %41 = arith.select %38, %39, %40 : vector<1x1x128xi1>, vector<1x1x128xf32>
    %c0_13 = arith.constant 0 : index
    %c0_14 = arith.constant 0 : index
    %c0_15 = arith.constant 0 : index
    %42 = vector.load %arg3[%c0_13, %c0_14, %c0_15] : memref<1x1x128xf32, #tpu.memory_space<vmem>>, vector<1x1x128xf32>
    tpu.vector_store %arg3[%c0_13, %c0_14, %c0_15], %41 {strides = array<i32>} : memref<1x1x128xf32, #tpu.memory_space<vmem>>, vector<1x1x128xf32>,
    return
  }
  func.func @transform_0(%arg0: i32) -> (i32, i32) {
    %c0_i32 = arith.constant 0 : i32
    %c0_i32_0 = arith.constant 0 : i32
    return %arg0, %c0_i32 : i32, i32
  }
  func.func @transform_1(%arg0: i32) -> (i32, i32) {
    %c0_i32 = arith.constant 0 : i32
    %c0_i32_0 = arith.constant 0 : i32
    return %arg0, %c0_i32 : i32, i32
  }
  func.func @transform_2(%arg0: i32) -> (i32, i32, i32) {
    %c0_i32 = arith.constant 0 : i32
    %c0_i32_0 = arith.constant 0 : i32
    %c0_i32_1 = arith.constant 0 : i32
    return %arg0, %c0_i32, %c0_i32_0 : i32, i32, i32
  }
}

</mosaic_0001>

<bundles_post_ra>
// kernel: tpu_custom_call.1
= control target key start
LH: loop header
LB: loop body
LE: loop exit
PB: predicated region body
PF: predicated region fallthrough
CT: control target
= control target key end

     0   :  { %s136_s0 = inlined_call_operand.vmem [shape: f32[8,32], index: 0, kind: input, shape index: {}]   ;;  %s137_s1 = inlined_call_operand.vmem [shape: s32[8,1], index: 1, kind: input, shape index: {}]   ;;  %s138_s2 = inlined_call_operand.hbm [shape: f32[1,1,128], index: 2, kind: output, shape index: {}]  }
   0x1   :  { %v13_v0 = vld [vmem:[%s137_s1] sm:$0xff] }
   0x2   :  { %7 = vsyncpa [#allocation3], 0  ;;  %v101_v1 = vmov 0   ;;  %v12_v2 = vld [vmem:[%s136_s0] sm:$0xff]  ;;  %vm21_vm0 = vcmask 261120   ;;  %v14_v4 = vlaneseq  ;;  %vm39_vm2 = vcmp.ne.s32.totalorder %v13_v0, 0 }
   0x3   :  { %76 = vset.pattern.permute.xlu0 %v101_v1  ;;  %v25_v3 = vsel %vm21_vm0, %v12_v2, 0.0  ;;  %vm43_vm3 = vcmask 7168   ;;  %s102_s0 = smov [#allocation2]  }
   0x4   :  { %17 = vperm.xlu0 %76, %v13_v0   ;;  %26 = vadd.xlane.f32.xlu1 %v25_v3  ;;  %v15_v5 = vand.u32 127, %v14_v4  ;;  %s64_s1 = sshll.u32 %s102_s0, 4  ;;  %s65_s1 = int_to_ptr.vmem [resolvable:$true] %s64_s1 }
   0x5   :  { %s77_s14 = scalar_lea.vmem %s65_s1, 16  ;;  %s81_s15 = scalar_lea.vmem %s65_s1, 32 }
   0x6   :  { %vm54_vm4 = vcmp.eq.s32.totalorder %v15_v5, 0  ;;  %p78_p0 = scmp.ne.s32.totalorder %s65_s1, %s77_s14  ;;  %p82_p1 = scmp.lt.s32.totalorder %s65_s1, %s65_s1 }
   0x7   :  { %p83_p2 = scmp.lt.s32.totalorder %s81_s15, %s77_s14 }
   0x9   :  { %p84_p3 = por %p83_p2, %p82_p1 }
   0xb   :  { %p85_p4 = pnand %p84_p3, %p78_p0 }
  0x83   :  { %v18_v6 = vpop.permute.xlu0 %17 }
  0x84   :  { %vm19_vm1 = vcmp.eq.s32.totalorder %v15_v5, %v18_v6 }
  0x85   :  { %v20_v7 = vsel %vm19_vm1, %v12_v2, 0.0 }
  0x86   :  { %v22_v8 = vsel %vm21_vm0, %v20_v7, 0.0 }
  0x87   :  { %23 = vadd.xlane.f32.xlu0 %v22_v8 }
  0x91   :  { %v27_v9 = vpop.xlane.xlu1 %26 }
 0x114   :  { %v24_v10 = vpop.xlane.xlu0 %23 }
 0x115   :  { %v29_v11 = vsub.f32 %v27_v9, %v24_v10  ;;  %v28_v13 = vmul.f32 0.9, %v24_v10 }
 0x117   :  { %v30_v12 = vsub.f32 %v29_v11, %v12_v2 }
 0x119   :  { %v31_v14 = vmul.f32 0.0033333334, %v30_v12 }
 0x11b   :  { %v32_v15 = vadd.f32 %v31_v14, %v28_v13 }
 0x11d   :  { %v33_v16 = vsub.f32 -0.66520274, %v32_v15 }
 0x11f   :  { %v42_v17 = vsel %vm39_vm2, %v33_v16, 0.0 }
 0x120   :  { %v44_v18 = vsel %vm43_vm3, %v42_v17, 0.0 }
 0x121   :  { %45 = vadd.xlane.f32.xlu1 %v44_v18 }
 0x1ae   :  { %v46_v19 = vpop.xlane.xlu1 %45 }
 0x1af   :  { %v47_v20 = vrot.slane %v46_v19, 4 }
 0x1b1   :  { %v48_v21 = vadd.f32 %v47_v20, %v46_v19 }
 0x1b3   :  { %v49_v22 = vrot.slane %v48_v21, 2 }
 0x1b5   :  { %v50_v23 = vadd.f32 %v49_v22, %v48_v21 }
 0x1b7   :  { %v51_v24 = vrot.slane %v50_v23, 1 }
 0x1b9   :  { %v52_v25 = vadd.f32 %v51_v24, %v50_v23 }
 0x1bb   :  { %72 = vpush %v52_v25 }
 0x1ec   :  { %s73_s13 = spop %72 }
 0x1ed   :  { %v55_v26 = vstv %s73_s13 }
 0x1ee   :  { %v56_v27 = vsel %vm54_vm4, %v55_v26, 0.0 }
 0x1ef   :  { %57 = vst [vmem:[#allocation2] sm:$0x1] %v56_v27 }
 0x1f0   :  { %88 = shalt.err (!%p85_p4)
}
 0x1f1   :  { %s89_s18 = scalar_lea.hbm %s138_s2, 16 }
 0x1f2   :  { %p90_p5 = scmp.ne.s32.totalorder %s138_s2, %s89_s18  ;;  %p93_p6 = scmp.lt.u32.totalorder %s89_s18, %s138_s2 }
 0x1f4   :  { %p95_p7 = pnand %p93_p6, %p90_p5 }
 0x1f6   :  { %98 = shalt.err (!%p95_p7)
}
 0x1f7   :  { %67 = dma.vmem_to_hbm [thread:$0]  %s65_s1, 16, %s138_s2, [#allocation3]  }
 0x1f8   :  { %99 = dma.done.wait [#allocation3], 16  }
 0x1f9   :  { %100 = vsyncadd [#allocation3], 4294967280 }
 0x1fa   :  { %71 = vsyncpa [#allocation3], 1 }

</bundles_post_ra>
